<compile_context>
chip_gen: v5e
topology: v5e:2x2
jax: 0.10.0
libtpu: 0.0.40
codegen_flags: <defaults>
</compile_context>

<pallas_src>
import functools

import jax
import jax.numpy as jnp
from jax.experimental import pallas as pl
from jax.experimental.pallas import tpu as pltpu


def _round_up(n: int, m: int) -> int:
    return ((n + m - 1) // m) * m


def _mlp_kernel(x_ref, w1_ref, b1_ref, w2_ref, b2_ref, w3_ref, b3_ref, o_ref):
    # Layer 1: Linear + ReLU (bf16 operands on the MXU, f32 accumulation / epilogue).
    # If x is already bf16 the astype is a no-op; do NOT cast in the wrapper (extra HBM trip).
    x = x_ref[...].astype(jnp.bfloat16)
    h1 = jnp.dot(x, w1_ref[...], preferred_element_type=jnp.float32)
    h1 = jnp.maximum(h1 + b1_ref[...], 0.0)
    # Layer 2: Linear + ReLU
    h2 = jnp.dot(h1.astype(jnp.bfloat16), w2_ref[...],
                 preferred_element_type=jnp.float32)
    h2 = jnp.maximum(h2 + b2_ref[...], 0.0)
    # Layer 3: Linear (no activation)
    out = jnp.dot(h2.astype(jnp.bfloat16), w3_ref[...],
                  preferred_element_type=jnp.float32)
    o_ref[...] = (out + b3_ref[...]).astype(o_ref.dtype)


def _choose_tile_b(batch: int, tile_b: int) -> int:
    """Pick a legal, performant batch tile.

    - Multiple of 16 (bf16 sublane packing after the f32->bf16 cast), >= 16.
    - If a single tile would cover the whole batch and the batch is large, split into
      >=2 grid steps so v7x's second TensorCore participates.
    - For small batches, shrink the tile to round_up(B, 8) (legal block, no waste).
    """
    tile_b = max(16, (tile_b // 16) * 16)
    b_ceil = _round_up(batch, 8)
    if b_ceil <= tile_b:
        if batch >= 256:
            tile_b = _round_up(pl.cdiv(batch, 2), 16)
        else:
            tile_b = b_ceil
    return tile_b


@functools.partial(jax.jit, static_argnames=("tile_b",))
def linear_model_forward(x, w1, b1, w2, b2, w3, b3, *, tile_b=1024):
    """y = relu(x @ W1 + b1); y = relu(y @ W2 + b2); y = y @ W3 + b3.

    Weights are pre-transposed: Wi has shape (fan_in, fan_out), bi has shape (1, fan_out).
    Weights may be bf16 (recommended); biases are f32.  x may be f32 or bf16.
    """
    B, in_features = x.shape
    h1_dim = w1.shape[1]
    h2_dim = w2.shape[1]
    out_features = w3.shape[1]

    # Lane-dense hidden activations: zero-pad hidden dims up to a multiple of 128.
    # Zero weight columns + zero bias entries are mathematically inert.
    h1_pad = _round_up(h1_dim, 128)
    h2_pad = _round_up(h2_dim, 128)
    if h1_pad != h1_dim:
        w1 = jnp.pad(w1, ((0, 0), (0, h1_pad - h1_dim)))
        b1 = jnp.pad(b1, ((0, 0), (0, h1_pad - h1_dim)))
        w2 = jnp.pad(w2, ((0, h1_pad - h1_dim), (0, 0)))
    if h2_pad != h2_dim:
        w2 = jnp.pad(w2, ((0, 0), (0, h2_pad - h2_dim)))
        b2 = jnp.pad(b2, ((0, 0), (0, h2_pad - h2_dim)))
        w3 = jnp.pad(w3, ((0, h2_pad - h2_dim), (0, 0)))

    tile_b = _choose_tile_b(B, tile_b)
    grid = (pl.cdiv(B, tile_b),)

    def stationary(shape):
        # Weight/bias blocks: full array, same block for every grid step
        # (DMA'd once, resident across the batch grid).
        return pl.BlockSpec(shape, lambda i: (0, 0))

    out = pl.pallas_call(
        _mlp_kernel,
        out_shape=jax.ShapeDtypeStruct((B, out_features), jnp.float32),
        grid=grid,
        in_specs=[
            pl.BlockSpec((tile_b, in_features), lambda i: (i, 0)),
            stationary(w1.shape), stationary(b1.shape),
            stationary(w2.shape), stationary(b2.shape),
            stationary(w3.shape), stationary(b3.shape),
        ],
        # Last dim equals the full out_features -> legal full-dim block; no pad/slice.
        out_specs=pl.BlockSpec((tile_b, out_features), lambda i: (i, 0)),
        compiler_params=pltpu.CompilerParams(
            dimension_semantics=("parallel",),
            vmem_limit_bytes=32 * 1024 * 1024,
        ),
    )(x, w1, b1, w2, b2, w3, b3)

    return out


def init_linear_params(key, fan_in, fan_out):
    """PyTorch-style nn.Linear init: U(-1/sqrt(fan_in), 1/sqrt(fan_in)).

    Returns W with shape (fan_in, fan_out) (pre-transposed) and b with shape (1, fan_out),
    both in float32.
    """
    kw, kb = jax.random.split(key)
    bound = 1.0 / jnp.sqrt(jnp.float32(fan_in))
    w = jax.random.uniform(kw, (fan_in, fan_out), jnp.float32, -bound, bound)
    b = jax.random.uniform(kb, (1, fan_out), jnp.float32, -bound, bound)
    return w, b


def _reference_f32(x, w1, b1, w2, b2, w3, b3):
    h = jnp.maximum(x @ w1 + b1, 0.0)
    h = jnp.maximum(h @ w2 + b2, 0.0)
    return h @ w3 + b3


def _reference_bf16(x, w1, b1, w2, b2, w3, b3):
    # Mirrors the kernel's mixed precision (bf16 operands, f32 accumulation/epilogue).
    bf = jnp.bfloat16
    h = jnp.dot(x.astype(bf), w1.astype(bf), preferred_element_type=jnp.float32) + b1
    h = jnp.maximum(h, 0.0)
    h = jnp.dot(h.astype(bf), w2.astype(bf), preferred_element_type=jnp.float32) + b2
    h = jnp.maximum(h, 0.0)
    return jnp.dot(h.astype(bf), w3.astype(bf), preferred_element_type=jnp.float32) + b3


if __name__ == "__main__":
    # Shapes implied by the module's forward: x is (batch, input_features).
    batch = 8
    input_features = 32
    hidden_dim_1 = 64
    hidden_dim_2 = 64
    out_features = 16

    key = jax.random.PRNGKey(0)
    kx, k1, k2, k3 = jax.random.split(key, 4)

    x = jax.random.normal(kx, (batch, input_features), jnp.float32)
    w1_f32, b1 = init_linear_params(k1, input_features, hidden_dim_1)
    w2_f32, b2 = init_linear_params(k2, hidden_dim_1, hidden_dim_2)
    w3_f32, b3 = init_linear_params(k3, hidden_dim_2, out_features)

    # Kernel stores weights in bf16 (MXU-native); biases stay f32.
    w1 = w1_f32.astype(jnp.bfloat16)
    w2 = w2_f32.astype(jnp.bfloat16)
    w3 = w3_f32.astype(jnp.bfloat16)

    out = linear_model_forward(x, w1, b1, w2, b2, w3, b3)
    out = jax.block_until_ready(out)
    assert out.shape == (batch, out_features)

    # Tight check against a reference that emulates the kernel's mixed precision.
    ref_mixed = _reference_bf16(x, w1_f32, b1, w2_f32, b2, w3_f32, b3)
    assert jnp.allclose(out, ref_mixed, atol=1e-3, rtol=1e-3)

    # Loose check against the full-f32 PyTorch-equivalent forward.
    # (bf16 weights/activations vs. the f32 nn.Module — acceptable for inference.)
    ref_f32 = _reference_f32(x, w1_f32, b1, w2_f32, b2, w3_f32, b3)
    assert jnp.allclose(out, ref_f32, atol=5e-2, rtol=5e-2)

    print("KERNEL_OK")
</pallas_src>

<mosaic_0001>
module attributes {stable_mosaic.version = 11 : i64} {
  func.func @_mlp_kernel(%arg0: i32, %arg1: memref<8x32xf32, #tpu.memory_space<vmem>>, %arg2: memref<32x128xbf16, #tpu.memory_space<vmem>>, %arg3: memref<1x128xf32, #tpu.memory_space<vmem>>, %arg4: memref<128x128xbf16, #tpu.memory_space<vmem>>, %arg5: memref<1x128xf32, #tpu.memory_space<vmem>>, %arg6: memref<128x16xbf16, #tpu.memory_space<vmem>>, %arg7: memref<1x16xf32, #tpu.memory_space<vmem>>, %arg8: memref<8x16xf32, #tpu.memory_space<vmem>>) attributes {dimension_semantics = [#tpu.dimension_semantics<parallel>], iteration_bounds = array<i64: 1>, scalar_prefetch = 0 : i64, scratch_operands = 0 : i64, tpu.core_type = #tpu.core_type<tc>, window_params = [{transform_indices = @transform_0, window_bounds = array<i64: 8, 32>}, {pipeline_mode = #tpu.pipeline_mode<synchronous>, transform_indices = @transform_1, window_bounds = array<i64: 32, 128>}, {pipeline_mode = #tpu.pipeline_mode<synchronous>, transform_indices = @transform_2, window_bounds = array<i64: 1, 128>}, {pipeline_mode = #tpu.pipeline_mode<synchronous>, transform_indices = @transform_3, window_bounds = array<i64: 128, 128>}, {pipeline_mode = #tpu.pipeline_mode<synchronous>, transform_indices = @transform_4, window_bounds = array<i64: 1, 128>}, {pipeline_mode = #tpu.pipeline_mode<synchronous>, transform_indices = @transform_5, window_bounds = array<i64: 128, 16>}, {pipeline_mode = #tpu.pipeline_mode<synchronous>, transform_indices = @transform_6, window_bounds = array<i64: 1, 16>}, {transform_indices = @transform_7, window_bounds = array<i64: 8, 16>}]} {
    %c0 = arith.constant 0 : index
    %c0_0 = arith.constant 0 : index
    %0 = vector.load %arg1[%c0, %c0_0] : memref<8x32xf32, #tpu.memory_space<vmem>>, vector<8x32xf32>
    %1 = arith.truncf %0 : vector<8x32xf32> to vector<8x32xbf16>
    %c0_1 = arith.constant 0 : index
    %c0_2 = arith.constant 0 : index
    %2 = vector.load %arg2[%c0_1, %c0_2] : memref<32x128xbf16, #tpu.memory_space<vmem>>, vector<32x128xbf16>
    %cst = arith.constant dense<0.000000e+00> : vector<8x128xf32>
    %3 = tpu.matmul %1, %2, %cst {dimension_numbers = #tpu.dot_dimension_numbers<[1], [0], [0], [1], [0, 0, 1, 1], [], []>} : vector<8x32xbf16>, vector<32x128xbf16>, vector<8x128xf32> -> vector<8x128xf32>
    %c0_3 = arith.constant 0 : index
    %c0_4 = arith.constant 0 : index
    %4 = vector.load %arg3[%c0_3, %c0_4] : memref<1x128xf32, #tpu.memory_space<vmem>>, vector<1x128xf32>
    %5 = vector.broadcast %4 : vector<1x128xf32> to vector<8x128xf32>
    %6 = arith.addf %3, %5 : vector<8x128xf32>
    %cst_5 = arith.constant 0.000000e+00 : f32
    %7 = vector.broadcast %cst_5 : f32 to vector<8x128xf32>
    %8 = arith.maximumf %6, %7 : vector<8x128xf32>
    %9 = arith.truncf %8 : vector<8x128xf32> to vector<8x128xbf16>
    %c0_6 = arith.constant 0 : index
    %c0_7 = arith.constant 0 : index
    %10 = vector.load %arg4[%c0_6, %c0_7] : memref<128x128xbf16, #tpu.memory_space<vmem>>, vector<128x128xbf16>
    %cst_8 = arith.constant dense<0.000000e+00> : vector<8x128xf32>
    %11 = tpu.matmul %9, %10, %cst_8 {dimension_numbers = #tpu.dot_dimension_numbers<[1], [0], [0], [1], [0, 0, 1, 1], [], []>} : vector<8x128xbf16>, vector<128x128xbf16>, vector<8x128xf32> -> vector<8x128xf32>
    %c0_9 = arith.constant 0 : index
    %c0_10 = arith.constant 0 : index
    %12 = vector.load %arg5[%c0_9, %c0_10] : memref<1x128xf32, #tpu.memory_space<vmem>>, vector<1x128xf32>
    %13 = vector.broadcast %12 : vector<1x128xf32> to vector<8x128xf32>
    %14 = arith.addf %11, %13 : vector<8x128xf32>
    %cst_11 = arith.constant 0.000000e+00 : f32
    %15 = vector.broadcast %cst_11 : f32 to vector<8x128xf32>
    %16 = arith.maximumf %14, %15 : vector<8x128xf32>
    %17 = arith.truncf %16 : vector<8x128xf32> to vector<8x128xbf16>
    %c0_12 = arith.constant 0 : index
    %c0_13 = arith.constant 0 : index
    %18 = vector.load %arg6[%c0_12, %c0_13] : memref<128x16xbf16, #tpu.memory_space<vmem>>, vector<128x16xbf16>
    %cst_14 = arith.constant dense<0.000000e+00> : vector<8x16xf32>
    %19 = tpu.matmul %17, %18, %cst_14 {dimension_numbers = #tpu.dot_dimension_numbers<[1], [0], [0], [1], [0, 0, 1, 1], [], []>} : vector<8x128xbf16>, vector<128x16xbf16>, vector<8x16xf32> -> vector<8x16xf32>
    %c0_15 = arith.constant 0 : index
    %c0_16 = arith.constant 0 : index
    %20 = vector.load %arg7[%c0_15, %c0_16] : memref<1x16xf32, #tpu.memory_space<vmem>>, vector<1x16xf32>
    %21 = vector.broadcast %20 : vector<1x16xf32> to vector<8x16xf32>
    %22 = arith.addf %19, %21 : vector<8x16xf32>
    %c0_17 = arith.constant 0 : index
    %c0_18 = arith.constant 0 : index
    %23 = vector.load %arg8[%c0_17, %c0_18] : memref<8x16xf32, #tpu.memory_space<vmem>>, vector<8x16xf32>
    tpu.vector_store %arg8[%c0_17, %c0_18], %22 {strides = array<i32>} : memref<8x16xf32, #tpu.memory_space<vmem>>, vector<8x16xf32>,
    return
  }
  func.func @transform_0(%arg0: i32) -> (i32, i32) {
    %c0_i32 = arith.constant 0 : i32
    %c0_i32_0 = arith.constant 0 : i32
    return %arg0, %c0_i32 : i32, i32
  }
  func.func @transform_1(%arg0: i32) -> (i32, i32) {
    %c0_i32 = arith.constant 0 : i32
    %c0_i32_0 = arith.constant 0 : i32
    %c0_i32_1 = arith.constant 0 : i32
    return %c0_i32, %c0_i32_0 : i32, i32
  }
  func.func @transform_2(%arg0: i32) -> (i32, i32) {
    %c0_i32 = arith.constant 0 : i32
    %c0_i32_0 = arith.constant 0 : i32
    %c0_i32_1 = arith.constant 0 : i32
    return %c0_i32, %c0_i32_0 : i32, i32
  }
  func.func @transform_3(%arg0: i32) -> (i32, i32) {
    %c0_i32 = arith.constant 0 : i32
    %c0_i32_0 = arith.constant 0 : i32
    %c0_i32_1 = arith.constant 0 : i32
    return %c0_i32, %c0_i32_0 : i32, i32
  }
  func.func @transform_4(%arg0: i32) -> (i32, i32) {
    %c0_i32 = arith.constant 0 : i32
    %c0_i32_0 = arith.constant 0 : i32
    %c0_i32_1 = arith.constant 0 : i32
    return %c0_i32, %c0_i32_0 : i32, i32
  }
  func.func @transform_5(%arg0: i32) -> (i32, i32) {
    %c0_i32 = arith.constant 0 : i32
    %c0_i32_0 = arith.constant 0 : i32
    %c0_i32_1 = arith.constant 0 : i32
    return %c0_i32, %c0_i32_0 : i32, i32
  }
  func.func @transform_6(%arg0: i32) -> (i32, i32) {
    %c0_i32 = arith.constant 0 : i32
    %c0_i32_0 = arith.constant 0 : i32
    %c0_i32_1 = arith.constant 0 : i32
    return %c0_i32, %c0_i32_0 : i32, i32
  }
  func.func @transform_7(%arg0: i32) -> (i32, i32) {
    %c0_i32 = arith.constant 0 : i32
    %c0_i32_0 = arith.constant 0 : i32
    return %arg0, %c0_i32 : i32, i32
  }
}

</mosaic_0001>

<bundles_post_ra>
// kernel: linear_model_forward.1
= control target key start
LH: loop header
LB: loop body
LE: loop exit
PB: predicated region body
PF: predicated region fallthrough
CT: control target
= control target key end

     0   :  { %s482_s0 = inlined_call_operand.vmem [shape: f32[8,32], index: 0, kind: input, shape index: {}]   ;;  %s483_s1 = inlined_call_operand.vmem [shape: bf16[32,128], index: 1, kind: input, shape index: {}]   ;;  %s484_s2 = inlined_call_operand.vmem [shape: f32[1,128], index: 2, kind: input, shape index: {}]   ;;  %s485_s3 = inlined_call_operand.vmem [shape: bf16[128,128], index: 3, kind: input, shape index: {}]   ;;  %s486_s4 = inlined_call_operand.vmem [shape: f32[1,128], index: 4, kind: input, shape index: {}]   ;;  %s487_s5 = inlined_call_operand.vmem [shape: bf16[128,16], index: 5, kind: input, shape index: {}]   ;;  %s488_s6 = inlined_call_operand.vmem [shape: f32[1,16], index: 6, kind: input, shape index: {}]   ;;  %s489_s7 = inlined_call_operand.hbm [shape: f32[8,16], index: 7, kind: output, shape index: {}]  }
   0x1   :  { %v325_v0 = vld [vmem:[%s483_s1 + $0x8] sm:$0xff]  ;;  %v333_v1 = vld [vmem:[%s485_s3 + $0x38] sm:$0xff]  ;;  %v324_v2 = vld [vmem:[%s483_s1] sm:$0xff] }
   0x2   :  { %60 = vmatpush.bf16.msra.mxu0 %v325_v0  ;;  %v28_v3 = vld [vmem:[%s482_s0] sm:$0xff]  ;;  %137 = vmatpush.bf16.msra.mxu1 %v333_v1  ;;  %v332_v4 = vld [vmem:[%s485_s3 + $0x30] sm:$0xff] }
   0x3   :  { %12 = vsyncpa [#allocation3], 0  ;;  %v29_v5 = vpack.c.bf16 %v28_v3, %v28_v3  ;;  %vm50_vm0 = vcmask 261120   ;;  %v331_v6 = vld [vmem:[%s485_s3 + $0x28] sm:$0xff]  ;;  %v330_v7 = vld [vmem:[%s485_s3 + $0x20] sm:$0xff]  ;;  %s372_s16 = smov [#allocation2]  }
   0x4   :  { %v329_v8 = vld [vmem:[%s485_s3 + $0x18] sm:$0xff]  ;;  %v328_v9 = vld [vmem:[%s485_s3 + $0x10] sm:$0xff]  ;;  %v327_v10 = vld [vmem:[%s485_s3 + $0x8] sm:$0xff]  ;;  %s240_s17 = sshll.u32 %s372_s16, 4  ;;  %vm233_vm1 = vcmask 130048   ;;  %s241_s17 = int_to_ptr.vmem [resolvable:$true] %s240_s17 }
   0x5   :  { %v326_v11 = vld [vmem:[%s485_s3] sm:$0xff]  ;;  %v341_v12 = vld [vmem:[%s487_s5 + $0x38] sm:$0xff]  ;;  %v340_v13 = vld [vmem:[%s487_s5 + $0x30] sm:$0xff] }
   0x6   :  { %61 = vmatpush.bf16.msra.mxu0 %v324_v2  ;;  %138 = vmatpush.bf16.msra.mxu1 %v332_v4  ;;  %v339_v14 = vld [vmem:[%s487_s5 + $0x28] sm:$0xff]  ;;  %v338_v15 = vld [vmem:[%s487_s5 + $0x20] sm:$0xff]  ;;  %v337_v16 = vld [vmem:[%s487_s5 + $0x18] sm:$0xff] }
   0x7   :  { %220 = vmatpush.bf16.msra.mxu2 %v341_v12  ;;  %v336_v17 = vld [vmem:[%s487_s5 + $0x10] sm:$0xff]  ;;  %v343_v18 = vld [vmem:[%s484_s2] ss:$0 sm:$0xff]  ;;  %v335_v24 = vld [vmem:[%s487_s5 + $0x8] sm:$0xff] }
   0x8   :  { %v334_v25 = vld [vmem:[%s487_s5] sm:$0xff]  ;;  %s242_s5 = sshll.u32 %s489_s7, 4  ;;  %s243_s5 = int_to_ptr.hbm [resolvable:$true] %s242_s5 }
   0x9   :  { %259 = vmatmul.msk.bf16.vlgmr.msra.gmra.mxu0 %vm50_vm0, %v29_v5  ;;  %v344_v26 = vld [vmem:[%s486_s4] ss:$0 sm:$0xff] }
   0xa   :  { %139 = vmatpush.bf16.msra.mxu1 %v331_v6  ;;  %v345_v32 = vld [vmem:[%s488_s6] ss:$0 sm:$0xff] }
   0xb   :  { %221 = vmatpush.bf16.msra.mxu2 %v340_v13 }
   0xe   :  { %140 = vmatpush.bf16.msra.mxu1 %v330_v7 }
   0xf   :  { %222 = vmatpush.bf16.msra.mxu2 %v339_v14 }
  0x12   :  { %141 = vmatpush.bf16.msra.mxu1 %v329_v8 }
  0x13   :  { %223 = vmatpush.bf16.msra.mxu2 %v338_v15 }
  0x16   :  { %142 = vmatpush.bf16.msra.mxu1 %v328_v9 }
  0x17   :  { %224 = vmatpush.bf16.msra.mxu2 %v337_v16 }
  0x1a   :  { %143 = vmatpush.bf16.msra.mxu1 %v327_v10 }
  0x1b   :  { %225 = vmatpush.bf16.msra.mxu2 %v336_v17 }
  0x1e   :  { %144 = vmatpush.bf16.msra.mxu1 %v326_v11 }
  0x1f   :  { %226 = vmatpush.bf16.msra.mxu2 %v335_v24 }
  0x23   :  { %227 = vmatpush.bf16.msra.mxu2 %v334_v25 }
  0x86   :  { %v63_v19 = vpop.f32.mrf.mxu0 }
  0x87   :  { %v64_v20 = vadd.f32 %v343_v18, %v63_v19 }
  0x89   :  { %v67_v21 = vmax.f32 %v64_v20, 0.0 }
  0x8b   :  { %v68_v22 = vpack.c.bf16 %v67_v21, %v67_v21 }
  0x8d   :  { %145 = vmatmul.bf16.vlgmr.msra.gmra.mxu1 %v68_v22 }
  0x8e   :  { %v65_v23 = vpop.f32.mrf.mxu0 }
 0x10a   :  { %v146_v27 = vpop.f32.mrf.mxu1 }
 0x10b   :  { %v147_v28 = vadd.f32 %v344_v26, %v146_v27 }
 0x10d   :  { %v150_v29 = vmax.f32 %v147_v28, 0.0 }
 0x10f   :  { %v151_v30 = vpack.c.bf16 %v150_v29, %v150_v29 }
 0x111   :  { %228 = vmatmul.bf16.vlgmr.msra.gmra.mxu2 %v151_v30 }
 0x112   :  { %v148_v31 = vpop.f32.mrf.mxu1 }
 0x194   :  { %v229_v33 = vpop.f32.mrf.mxu2 }
 0x195   :  { %v230_v34 = vadd.f32 %v345_v32, %v229_v33 }
 0x197   :  { %234 = vst.msk [vmem:[#allocation2] sm:$0xff] %vm233_vm1, %v230_v34 }
 0x198   :  { %245 = dma.vmem_to_hbm [thread:$0]  %s241_s17, 128, %s243_s5, [#allocation3]  }
 0x19c   :  { %v231_v35 = vpop.f32.mrf.mxu2 }
 0x19d   :  { %370 = dma.done.wait [#allocation3], 128  }
 0x19e   :  { %371 = vsyncadd [#allocation3], 4294967168 }
 0x19f   :  { %250 = vsyncpa [#allocation3], 1 }

</bundles_post_ra>
